<compile_context>
chip_gen: v6e
topology: v6e:2x2x1
jax: 0.10.0
libtpu: 0.0.40
codegen_flags: <defaults>
</compile_context>

<pallas_src>
import functools

import jax
import jax.numpy as jnp
from jax.experimental import pallas as pl
from jax.experimental.pallas import tpu as pltpu


def _round_up(a, b):
    return ((a + b - 1) // b) * b


def _linear_kernel(x_ref, w_ref, b_ref, o_ref):
    # x_ref: (T, Kp)  w_ref: (Kp, Np)  b_ref: (1, Np)  o_ref: (T, Np)
    acc = jnp.dot(x_ref[...], w_ref[...], preferred_element_type=jnp.float32)
    # Minimal epilogue (v5e has a single vector-store slot): bias + cast + store.
    o_ref[...] = (acc + b_ref[...].astype(jnp.float32)).astype(o_ref.dtype)


def _pack_factor(c_out, m, max_p=4):
    """Smallest power-of-2 p <= max_p with (p*c_out) % 128 == 0 and p | m."""
    p = 1
    while p <= max_p:
        if (p * c_out) % 128 == 0 and m % p == 0:
            return p
        p *= 2
    return 1


def _pack_params(w_t, b, p):
    """Block-diagonal weight / tiled bias for row packing (exact)."""
    c_in, c_out = w_t.shape
    if p == 1:
        return w_t, b.reshape(1, c_out)
    w_p = jnp.zeros((p * c_in, p * c_out), dtype=w_t.dtype)
    for q in range(p):  # p <= 4, tiny weight: negligible cost
        w_p = w_p.at[q * c_in:(q + 1) * c_in, q * c_out:(q + 1) * c_out].set(w_t)
    b_p = jnp.tile(b, (p,)).reshape(1, p * c_out)
    return w_p, b_p


@functools.partial(jax.jit, static_argnames=("block_rows",))
def template_pair_embedder(x, w_t, b, *, block_rows=2048):
    """y = x @ w_t + b over the last dim.

    x:   [*, C_in]   (f32 or bf16; bf16 halves HBM traffic on this mem-bound op)
    w_t: [C_in, C_out]  (PyTorch weight, transposed)
    b:   [C_out]
    Returns [*, C_out] in x.dtype; accumulation is always f32 on the MXU.
    block_rows: target number of *source* rows per grid step (multiple of 16).
    """
    c_in = x.shape[-1]
    c_out = w_t.shape[-1]
    lead = x.shape[:-1]
    out_dtype = x.dtype

    m = 1
    for d in lead:
        m *= d

    # Row-packing factor so the output last dim is a multiple of 128 lanes.
    p = _pack_factor(c_out, m)
    kp, np_ = p * c_in, p * c_out
    m_p = m // p

    # Free (contiguous) reshape: fold p consecutive rows into one kernel row.
    x2 = x.reshape(m_p, kp)
    w_p, b_p = _pack_params(w_t, b, p)

    # Tile choice: big tiles amortize per-step overhead; keep >= ~8 grid steps
    # when there is enough work (v7x megacore balance). Multiples of 16 cover
    # the sublane constraint for both f32 and bf16.
    target = max(16, _round_up(max(block_rows // p, 1), 16))
    balance = max(512, _round_up(pl.cdiv(m_p, 8), 16))
    tile = max(16, min(target, balance, _round_up(m_p, 16)))
    grid = pl.cdiv(m_p, tile)  # ragged last tile handled by Pallas masking

    in_sz = jnp.dtype(x.dtype).itemsize
    w_sz = jnp.dtype(w_t.dtype).itemsize
    b_sz = jnp.dtype(b.dtype).itemsize
    out_sz = jnp.dtype(out_dtype).itemsize

    cost = pl.CostEstimate(
        flops=2 * m * c_in * c_out,
        transcendentals=0,
        bytes_accessed=(m * c_in * in_sz + c_in * c_out * w_sz
                        + c_out * b_sz + m * c_out * out_sz),
    )

    # Double-buffered working set + headroom; guard against v7x's 64 MiB VMEM.
    vmem_need = 2 * (tile * kp * in_sz + kp * np_ * w_sz + np_ * b_sz
                     + tile * np_ * out_sz)
    vmem_limit = int(min(max(2 * vmem_need + (4 << 20), 32 << 20), 64 << 20))

    out = pl.pallas_call(
        _linear_kernel,
        out_shape=jax.ShapeDtypeStruct((m_p, np_), out_dtype),
        grid_spec=pltpu.PrefetchScalarGridSpec(
            num_scalar_prefetch=0,
            grid=(grid,),
            in_specs=[
                pl.BlockSpec((tile, kp), lambda i: (i, 0)),
                pl.BlockSpec((kp, np_), lambda i: (0, 0)),   # weight: VMEM-resident
                pl.BlockSpec((1, np_), lambda i: (0, 0)),    # bias:   VMEM-resident
            ],
            out_specs=pl.BlockSpec((tile, np_), lambda i: (i, 0)),
        ),
        compiler_params=pltpu.CompilerParams(
            dimension_semantics=("parallel",),
            vmem_limit_bytes=vmem_limit,
        ),
        cost_estimate=cost,
    )(x2, w_p, b_p)

    # Free reshape back: (m_p, p*c_out) row-major == (*lead, c_out) row-major.
    return out.reshape(*lead, c_out)


def init_params(key, c_in, c_out, dtype=jnp.float32):
    """Matches Linear(..., init='relu'): he-normal weights (fan_in=c_in), zero bias."""
    std = (2.0 / c_in) ** 0.5
    w = std * jax.random.normal(key, (c_out, c_in), dtype=dtype)  # PyTorch layout
    b = jnp.zeros((c_out,), dtype=dtype)
    return w, b


if __name__ == "__main__":
    key = jax.random.PRNGKey(0)
    k_x, k_w = jax.random.split(key)

    # Template-pair-like shapes (kept small): x: [n_templ, n_res, n_res, c_in]
    # with the real OpenComplex channel sizes c_in=88, c_out=64.
    n_templ, n_res, c_in, c_out = 2, 16, 88, 64
    x = jax.random.normal(k_x, (n_templ, n_res, n_res, c_in), dtype=jnp.float32)

    w, b = init_params(k_w, c_in, c_out)
    w_t = jnp.asarray(w.T)  # [C_in, C_out]

    # f32 path (row-packed p=2 -> 128-lane stores).
    y = jax.block_until_ready(template_pair_embedder(x, w_t, b))
    y_ref = x @ w_t + b
    assert y.shape == (n_templ, n_res, n_res, c_out), y.shape
    assert jnp.allclose(y, y_ref, atol=1e-4, rtol=1e-4)

    # Odd row count -> packing falls back to p=1 and the last tile is ragged
    # (exercises the no-pad/no-slice masked path).
    x_odd = jax.random.normal(k_x, (1, 5, 5, c_in), dtype=jnp.float32)
    y_odd = jax.block_until_ready(template_pair_embedder(x_odd, w_t, b))
    assert y_odd.shape == (1, 5, 5, c_out)
    assert jnp.allclose(y_odd, x_odd @ w_t + b, atol=1e-4, rtol=1e-4)

    # bf16 streaming path (halves HBM traffic; f32 MXU accumulation).
    y_bf = jax.block_until_ready(
        template_pair_embedder(x.astype(jnp.bfloat16),
                               w_t.astype(jnp.bfloat16),
                               b.astype(jnp.bfloat16)))
    assert y_bf.dtype == jnp.bfloat16
    assert jnp.allclose(y_bf.astype(jnp.float32), y_ref, atol=6e-2, rtol=6e-2)

    print("KERNEL_OK")
</pallas_src>

<mosaic_0001>
module attributes {stable_mosaic.version = 11 : i64} {
  func.func @_linear_kernel(%arg0: i32, %arg1: memref<256x176xf32, #tpu.memory_space<vmem>>, %arg2: memref<176x128xf32, #tpu.memory_space<vmem>>, %arg3: memref<1x128xf32, #tpu.memory_space<vmem>>, %arg4: memref<256x128xf32, #tpu.memory_space<vmem>>) attributes {dimension_semantics = [#tpu.dimension_semantics<parallel>], iteration_bounds = array<i64: 1>, scalar_prefetch = 0 : i64, scratch_operands = 0 : i64, tpu.core_type = #tpu.core_type<tc>, window_params = [{transform_indices = @transform_0, window_bounds = array<i64: 256, 176>}, {pipeline_mode = #tpu.pipeline_mode<synchronous>, transform_indices = @transform_1, window_bounds = array<i64: 176, 128>}, {pipeline_mode = #tpu.pipeline_mode<synchronous>, transform_indices = @transform_2, window_bounds = array<i64: 1, 128>}, {transform_indices = @transform_3, window_bounds = array<i64: 256, 128>}]} {
    %c0 = arith.constant 0 : index
    %c0_0 = arith.constant 0 : index
    %0 = vector.load %arg1[%c0, %c0_0] : memref<256x176xf32, #tpu.memory_space<vmem>>, vector<256x176xf32>
    %c0_1 = arith.constant 0 : index
    %c0_2 = arith.constant 0 : index
    %1 = vector.load %arg2[%c0_1, %c0_2] : memref<176x128xf32, #tpu.memory_space<vmem>>, vector<176x128xf32>
    %cst = arith.constant dense<0.000000e+00> : vector<256x128xf32>
    %2 = tpu.matmul %0, %1, %cst {dimension_numbers = #tpu.dot_dimension_numbers<[1], [0], [0], [1], [0, 0, 1, 1], [], []>} : vector<256x176xf32>, vector<176x128xf32>, vector<256x128xf32> -> vector<256x128xf32>
    %c0_3 = arith.constant 0 : index
    %c0_4 = arith.constant 0 : index
    %3 = vector.load %arg3[%c0_3, %c0_4] : memref<1x128xf32, #tpu.memory_space<vmem>>, vector<1x128xf32>
    %4 = vector.broadcast %3 : vector<1x128xf32> to vector<256x128xf32>
    %5 = arith.addf %2, %4 : vector<256x128xf32>
    %c0_5 = arith.constant 0 : index
    %c0_6 = arith.constant 0 : index
    %6 = vector.load %arg4[%c0_5, %c0_6] : memref<256x128xf32, #tpu.memory_space<vmem>>, vector<256x128xf32>
    tpu.vector_store %arg4[%c0_5, %c0_6], %5 {strides = array<i32>} : memref<256x128xf32, #tpu.memory_space<vmem>>, vector<256x128xf32>,
    return
  }
  func.func @transform_0(%arg0: i32) -> (i32, i32) {
    %c0_i32 = arith.constant 0 : i32
    %c0_i32_0 = arith.constant 0 : i32
    return %arg0, %c0_i32 : i32, i32
  }
  func.func @transform_1(%arg0: i32) -> (i32, i32) {
    %c0_i32 = arith.constant 0 : i32
    %c0_i32_0 = arith.constant 0 : i32
    %c0_i32_1 = arith.constant 0 : i32
    return %c0_i32, %c0_i32_0 : i32, i32
  }
  func.func @transform_2(%arg0: i32) -> (i32, i32) {
    %c0_i32 = arith.constant 0 : i32
    %c0_i32_0 = arith.constant 0 : i32
    %c0_i32_1 = arith.constant 0 : i32
    return %c0_i32, %c0_i32_0 : i32, i32
  }
  func.func @transform_3(%arg0: i32) -> (i32, i32) {
    %c0_i32 = arith.constant 0 : i32
    %c0_i32_0 = arith.constant 0 : i32
    return %arg0, %c0_i32 : i32, i32
  }
}

</mosaic_0001>

<bundles_post_ra>
// kernel: tile.9
= control target key start
LH: loop header
LB: loop body
LE: loop exit
PB: predicated region body
PF: predicated region fallthrough
CT: control target
= control target key end

     0   :  { %vm8_vm0 = vcmask 523264   ;;  %vm14_vm1 = vcmask 1048064   ;;  %s42_s0 = inlined_call_operand.vmem [shape: f32[2,64], index: 0, kind: input, shape index: {}]   ;;  %s43_s1 = inlined_call_operand.vmem [shape: f32[1,128], index: 1, kind: output, shape index: {}]  }
   0x1   :  { %v5_v0 = vld [vmem:[%s42_s0] sm:$0x3]  ;;  %s25_s0 = smov 64  }
   0x2   :  { %6 = vst [vmem:[#allocation1] sm:$0x3] %v5_v0 }
   0x9   :  { %v11_v1 = vld [vmem:[#allocation1 + $0x1] sm:$0x1]   ;;  %v7_v2 = vld [vmem:[#allocation1] sm:$0x1]  }
   0xa   :  { %12 = vrot.lane.b32.xlu0 %v11_v1, %s25_s0  ;;  %9 = vst.msk [vmem:[#allocation0] sm:$0x1] %vm8_vm0, %v7_v2  }
  0x7c   :  { %v13_v3 = vpop.permute.xlu0 %12  }
  0x7d   :  { %15 = vst.msk [vmem:[#allocation0] sm:$0x1] %vm14_vm1, %v13_v3  }
  0x84   :  { %v20_v4 = vld [vmem:[#allocation0] sm:$0x1] }
  0x85   :  { %23 = vst [vmem:[%s43_s1] sm:$0x1] %v20_v4 }

// kernel: tile.8
= control target key start
LH: loop header
LB: loop body
LE: loop exit
PB: predicated region body
PF: predicated region fallthrough
CT: control target
= control target key end

     0   :  { %s22_s0 = inlined_call_operand.vmem [shape: f32[64], index: 0, kind: input, shape index: {}]   ;;  %s23_s1 = inlined_call_operand.vmem [shape: f32[2,64], index: 1, kind: output, shape index: {}]  }
   0x1   :  { %v4_v0 = vld [vmem:[%s22_s0] ss:$0 sm:$0xff] }
   0x2   :  { %5 = vst [vmem:[%s23_s1] sm:$0x3] %v4_v0 }

// kernel: template_pair_embedder.1
= control target key start
LH: loop header
LB: loop body
LE: loop exit
PB: predicated region body
PF: predicated region fallthrough
CT: control target
= control target key end

     0   :  { %v543_v0 = vmov 0.0   ;;  %vm107_vm0 = vcmask 392192   ;;  %s1031_s1 = inlined_call_operand.vmem [shape: f32[176,128], index: 1, kind: input, shape index: {}]   ;;  %s1032_s0 = inlined_call_operand.vmem [shape: f32[256,176], index: 0, kind: input, shape index: {}]   ;;  %s1033_s2 = inlined_call_operand.vmem [shape: f32[1,128], index: 2, kind: input, shape index: {}]   ;;  %s1034_s3 = inlined_call_operand.vmem [shape: f32[256,128], index: 3, kind: output, shape index: {}]  }
   0x1   :  { %204 = vmatprep.subr.mxu0 %v543_v0  ;;  %498 = vmatprep.subr.mxu1 %v543_v0  ;;  %v93_v1 = vld [vmem:[%s1031_s1 + $0x78] sm:$0xff]  ;;  %v92_v2 = vld [vmem:[%s1031_s1 + $0x70] sm:$0xff]  ;;  %v91_v3 = vld [vmem:[%s1031_s1 + $0x68] sm:$0xff] }
   0x2   :  { %205 = vmatpush1.msra.mxu0 %v93_v1  ;;  %520 = vmatpush1.msra.mxu1 %v93_v1  ;;  %v90_v4 = vld [vmem:[%s1031_s1 + $0x60] sm:$0xff]  ;;  %v89_v5 = vld [vmem:[%s1031_s1 + $0x58] sm:$0xff]  ;;  %v88_v6 = vld [vmem:[%s1031_s1 + $0x50] sm:$0xff] }
   0x3   :  { %206 = vmatprep.subr.mxu0 %v543_v0  ;;  %499 = vmatprep.subr.mxu1 %v543_v0  ;;  %v87_v7 = vld [vmem:[%s1031_s1 + $0x48] sm:$0xff]  ;;  %v86_v8 = vld [vmem:[%s1031_s1 + $0x40] sm:$0xff]  ;;  %v85_v9 = vld [vmem:[%s1031_s1 + $0x38] sm:$0xff] }
   0x4   :  { %207 = vmatpush1.msra.mxu0 %v92_v2  ;;  %521 = vmatpush1.msra.mxu1 %v92_v2  ;;  %v84_v10 = vld [vmem:[%s1031_s1 + $0x30] sm:$0xff]  ;;  %v83_v11 = vld [vmem:[%s1031_s1 + $0x28] sm:$0xff]  ;;  %v82_v12 = vld [vmem:[%s1031_s1 + $0x20] sm:$0xff] }
   0x5   :  { %208 = vmatprep.subr.mxu0 %v543_v0  ;;  %500 = vmatprep.subr.mxu1 %v543_v0  ;;  %v81_v13 = vld [vmem:[%s1031_s1 + $0x18] sm:$0xff]  ;;  %v80_v14 = vld [vmem:[%s1031_s1 + $0x10] sm:$0xff]  ;;  %v79_v15 = vld [vmem:[%s1031_s1 + $0x8] sm:$0xff] }
   0x6   :  { %209 = vmatpush1.msra.mxu0 %v91_v3  ;;  %522 = vmatpush1.msra.mxu1 %v91_v3  ;;  %v78_v16 = vld [vmem:[%s1031_s1] sm:$0xff]  ;;  %v99_v17 = vld [vmem:[%s1031_s1 + $0xa8] sm:$0xff]  ;;  %v97_v19 = vld [vmem:[%s1031_s1 + $0x98] sm:$0xff] }
   0x7   :  { %210 = vmatprep.subr.mxu0 %v543_v0  ;;  %501 = vmatprep.subr.mxu1 %v543_v0  ;;  %v98_v18 = vld [vmem:[%s1031_s1 + $0xa0] sm:$0xff]  ;;  %v96_v20 = vld [vmem:[%s1031_s1 + $0x90] sm:$0xff]  ;;  %v95_v21 = vld [vmem:[%s1031_s1 + $0x88] sm:$0xff] }
   0x8   :  { %211 = vmatpush1.msra.mxu0 %v90_v4  ;;  %523 = vmatpush1.msra.mxu1 %v90_v4  ;;  %v94_v22 = vld [vmem:[%s1031_s1 + $0x80] sm:$0xff]  ;;  %v15_v23 = vld [vmem:[%s1032_s0 + $0x8] sm:$0xff]  ;;  %v17_v27 = vld [vmem:[%s1032_s0 + $0x18] sm:$0xff] }
   0x9   :  { %212 = vmatprep.subr.mxu0 %v543_v0  ;;  %502 = vmatprep.subr.mxu1 %v543_v0  ;;  %v47_v24 = vld [vmem:[%s1032_s0 + $0x108] sm:$0xff]  ;;  %v14_v25 = vld [vmem:[%s1032_s0] sm:$0xff]  ;;  %v49_v28 = vld [vmem:[%s1032_s0 + $0x118] sm:$0xff] }
   0xa   :  { %213 = vmatpush1.msra.mxu0 %v89_v5  ;;  %524 = vmatpush1.msra.mxu1 %v89_v5  ;;  %v46_v26 = vld [vmem:[%s1032_s0 + $0x100] sm:$0xff]  ;;  %v16_v29 = vld [vmem:[%s1032_s0 + $0x10] sm:$0xff]  ;;  %v19_v31 = vld [vmem:[%s1032_s0 + $0x28] sm:$0xff] }
   0xb   :  { %214 = vmatprep.subr.mxu0 %v543_v0  ;;  %503 = vmatprep.subr.mxu1 %v543_v0  ;;  %v48_v30 = vld [vmem:[%s1032_s0 + $0x110] sm:$0xff]  ;;  %v51_v32 = vld [vmem:[%s1032_s0 + $0x128] sm:$0xff]  ;;  %v18_v33 = vld [vmem:[%s1032_s0 + $0x20] sm:$0xff] }
   0xc   :  { %215 = vmatpush1.msra.mxu0 %v88_v6  ;;  %525 = vmatpush1.msra.mxu1 %v88_v6  ;;  %v50_v34 = vld [vmem:[%s1032_s0 + $0x120] sm:$0xff]  ;;  %v21_v35 = vld [vmem:[%s1032_s0 + $0x38] sm:$0xff]  ;;  %v20_v37 = vld [vmem:[%s1032_s0 + $0x30] sm:$0xff] }
   0xd   :  { %216 = vmatprep.subr.mxu0 %v543_v0  ;;  %504 = vmatprep.subr.mxu1 %v543_v0  ;;  %v53_v36 = vld [vmem:[%s1032_s0 + $0x138] sm:$0xff]  ;;  %v52_v38 = vld [vmem:[%s1032_s0 + $0x130] sm:$0xff]  ;;  %v23_v39 = vld [vmem:[%s1032_s0 + $0x48] sm:$0xff] }
   0xe   :  { %217 = vmatpush1.msra.mxu0 %v87_v7  ;;  %526 = vmatpush1.msra.mxu1 %v87_v7  ;;  %v55_v40 = vld [vmem:[%s1032_s0 + $0x148] sm:$0xff]  ;;  %v22_v41 = vld [vmem:[%s1032_s0 + $0x40] sm:$0xff]  ;;  %v25_v43 = vld [vmem:[%s1032_s0 + $0x58] sm:$0xff] }
   0xf   :  { %218 = vmatprep.subr.mxu0 %v543_v0  ;;  %505 = vmatprep.subr.mxu1 %v543_v0  ;;  %v54_v42 = vld [vmem:[%s1032_s0 + $0x140] sm:$0xff]  ;;  %v57_v44 = vld [vmem:[%s1032_s0 + $0x158] sm:$0xff]  ;;  %v24_v45 = vld [vmem:[%s1032_s0 + $0x50] sm:$0xff] }
  0x10   :  { %219 = vmatpush1.msra.mxu0 %v86_v8  ;;  %527 = vmatpush1.msra.mxu1 %v86_v8  ;;  %v56_v46 = vld [vmem:[%s1032_s0 + $0x150] sm:$0xff]  ;;  %v27_v47 = vld [vmem:[%s1032_s0 + $0x68] sm:$0xff]  ;;  %v26_v49 = vld [vmem:[%s1032_s0 + $0x60] sm:$0xff] }
  0x11   :  { %220 = vmatprep.subr.mxu0 %v543_v0  ;;  %506 = vmatprep.subr.mxu1 %v543_v0  ;;  %v59_v48 = vld [vmem:[%s1032_s0 + $0x168] sm:$0xff]  ;;  %v58_v50 = vld [vmem:[%s1032_s0 + $0x160] sm:$0xff]  ;;  %v29_v51 = vld [vmem:[%s1032_s0 + $0x78] sm:$0xff] }
  0x12   :  { %221 = vmatpush1.msra.mxu0 %v85_v9  ;;  %528 = vmatpush1.msra.mxu1 %v85_v9  ;;  %v61_v52 = vld [vmem:[%s1032_s0 + $0x178] sm:$0xff]  ;;  %v28_v53 = vld [vmem:[%s1032_s0 + $0x70] sm:$0xff]  ;;  %v31_v55 = vld [vmem:[%s1032_s0 + $0x88] sm:$0xff] }
  0x13   :  { %222 = vmatprep.subr.mxu0 %v543_v0  ;;  %507 = vmatprep.subr.mxu1 %v543_v0  ;;  %v60_v54 = vld [vmem:[%s1032_s0 + $0x170] sm:$0xff]  ;;  %v63_v56 = vld [vmem:[%s1032_s0 + $0x188] sm:$0xff]  ;;  %v30_v57 = vld [vmem:[%s1032_s0 + $0x80] sm:$0xff] }
  0x14   :  { %223 = vmatpush1.msra.mxu0 %v84_v10  ;;  %529 = vmatpush1.msra.mxu1 %v84_v10  ;;  %v62_v58 = vld [vmem:[%s1032_s0 + $0x180] sm:$0xff]  ;;  %v33_v59 = vld [vmem:[%s1032_s0 + $0x98] sm:$0xff]  ;;  %v32_v61 = vld [vmem:[%s1032_s0 + $0x90] sm:$0xff] }
  0x15   :  { %224 = vmatprep.subr.mxu0 %v543_v0  ;;  %508 = vmatprep.subr.mxu1 %v543_v0  ;;  %v65_v60 = vld [vmem:[%s1032_s0 + $0x198] sm:$0xff]  ;;  %v64_v62 = vld [vmem:[%s1032_s0 + $0x190] sm:$0xff]  ;;  %v35_v63 = vld [vmem:[%s1032_s0 + $0xa8] sm:$0xff] }
  0x16   :  { %225 = vmatpush1.msra.mxu0 %v83_v11  ;;  %530 = vmatpush1.msra.mxu1 %v83_v11  ;;  %v34_v1 = vld [vmem:[%s1032_s0 + $0xa0] sm:$0xff]  ;;  %v37_v3 = vld [vmem:[%s1032_s0 + $0xb8] sm:$0xff]  ;;  %v36_v5 = vld [vmem:[%s1032_s0 + $0xb0] sm:$0xff] }
  0x17   :  { %226 = vmatprep.subr.mxu0 %v543_v0  ;;  %509 = vmatprep.subr.mxu1 %v543_v0  ;;  %v66_v2 = vld [vmem:[%s1032_s0 + $0x1a0] sm:$0xff]  ;;  %v69_v4 = vld [vmem:[%s1032_s0 + $0x1b8] sm:$0xff]  ;;  %v68_v6 = vld [vmem:[%s1032_s0 + $0x1b0] sm:$0xff] }
  0x18   :  { %227 = vmatpush1.msra.mxu0 %v82_v12  ;;  %531 = vmatpush1.msra.mxu1 %v82_v12  ;;  %v39_v7 = vld [vmem:[%s1032_s0 + $0xc8] sm:$0xff]  ;;  %v38_v9 = vld [vmem:[%s1032_s0 + $0xc0] sm:$0xff]  ;;  %v41_v11 = vld [vmem:[%s1032_s0 + $0xd8] sm:$0xff] }
  0x19   :  { %228 = vmatprep.subr.mxu0 %v543_v0  ;;  %510 = vmatprep.subr.mxu1 %v543_v0  ;;  %v71_v8 = vld [vmem:[%s1032_s0 + $0x1c8] sm:$0xff]  ;;  %v70_v10 = vld [vmem:[%s1032_s0 + $0x1c0] sm:$0xff]  ;;  %v73_v12 = vld [vmem:[%s1032_s0 + $0x1d8] sm:$0xff] }
  0x1a   :  { %229 = vmatpush1.msra.mxu0 %v81_v13  ;;  %532 = vmatpush1.msra.mxu1 %v81_v13  ;;  %v40_v13 = vld [vmem:[%s1032_s0 + $0xd0] sm:$0xff] }
  0x1b   :  { %230 = vmatprep.subr.mxu0 %v543_v0  ;;  %511 = vmatprep.subr.mxu1 %v543_v0 }
  0x1c   :  { %231 = vmatpush1.msra.mxu0 %v80_v14  ;;  %533 = vmatpush1.msra.mxu1 %v80_v14  ;;  %v72_v14 = vld [vmem:[%s1032_s0 + $0x1d0] sm:$0xff] }
  0x1d   :  { %232 = vmatprep.subr.mxu0 %v543_v0  ;;  %512 = vmatprep.subr.mxu1 %v543_v0 }
  0x1e   :  { %233 = vmatpush1.msra.mxu0 %v79_v15  ;;  %534 = vmatpush1.msra.mxu1 %v79_v15  ;;  %v43_v15 = vld [vmem:[%s1032_s0 + $0xe8] sm:$0xff] }
  0x1f   :  { %234 = vmatprep.subr.mxu0 %v543_v0  ;;  %513 = vmatprep.subr.mxu1 %v543_v0 }
  0x20   :  { %235 = vmatpush1.msra.mxu0 %v78_v16  ;;  %535 = vmatpush1.msra.mxu1 %v78_v16  ;;  %v75_v16 = vld [vmem:[%s1032_s0 + $0x1e8] sm:$0xff] }
  0x21   :  { %256 = vmatprep.subr.mxu0 %v543_v0  ;;  %514 = vmatprep.subr.mxu1 %v543_v0 }
  0x22   :  { %257 = vmatpush2.msra.mxu0 %v99_v17  ;;  %536 = vmatpush2.msra.mxu1 %v99_v17  ;;  %v42_v17 = vld [vmem:[%s1032_s0 + $0xe0] sm:$0xff] }
  0x23   :  { %258 = vmatprep.subr.mxu0 %v543_v0  ;;  %515 = vmatprep.subr.mxu1 %v543_v0 }
  0x24   :  { %259 = vmatpush2.msra.mxu0 %v98_v18  ;;  %537 = vmatpush2.msra.mxu1 %v98_v18  ;;  %v74_v18 = vld [vmem:[%s1032_s0 + $0x1e0] sm:$0xff] }
  0x25   :  { %260 = vmatprep.subr.mxu0 %v543_v0  ;;  %516 = vmatprep.subr.mxu1 %v543_v0 }
  0x26   :  { %261 = vmatpush2.msra.mxu0 %v97_v19  ;;  %538 = vmatpush2.msra.mxu1 %v97_v19  ;;  %v45_v19 = vld [vmem:[%s1032_s0 + $0xf8] sm:$0xff] }
  0x27   :  { %262 = vmatprep.subr.mxu0 %v543_v0  ;;  %517 = vmatprep.subr.mxu1 %v543_v0 }
  0x28   :  { %263 = vmatpush2.msra.mxu0 %v96_v20  ;;  %539 = vmatpush2.msra.mxu1 %v96_v20  ;;  %v77_v20 = vld [vmem:[%s1032_s0 + $0x1f8] sm:$0xff] }
  0x29   :  { %264 = vmatprep.subr.mxu0 %v543_v0  ;;  %518 = vmatprep.subr.mxu1 %v543_v0 }
  0x2a   :  { %265 = vmatpush2.msra.mxu0 %v95_v21  ;;  %540 = vmatpush2.msra.mxu1 %v95_v21  ;;  %v44_v21 = vld [vmem:[%s1032_s0 + $0xf0] sm:$0xff] }
  0x2b   :  { %266 = vmatprep.subr.mxu0 %v543_v0  ;;  %519 = vmatprep.subr.mxu1 %v543_v0  ;;  %v67_v0 = vld [vmem:[%s1032_s0 + $0x1a8] sm:$0xff] }
  0x2c   :  { %267 = vmatpush2.msra.mxu0 %v94_v22  ;;  %541 = vmatpush2.msra.mxu1 %v94_v22  ;;  %v76_v22 = vld [vmem:[%s1032_s0 + $0x1f0] sm:$0xff] }
  0x2d   :  { %466 = vmatprep.mubr.msk.f32.mxu0 %vm107_vm0, %v15_v23  ;;  %482 = vmatprep.mubr.msk.f32.mxu1 %vm107_vm0, %v47_v24  ;;  %v901_v23 = vld [vmem:[%s1033_s2] ss:$0 sm:$0xff] }
  0x2e   :  { %269 = vmatmul.mubr.f32.vlgmr.msra.gmra.mxu0 %v14_v25  ;;  %349 = vmatmul.mubr.f32.vlgmr.msra.gmra.mxu1 %v46_v26 }
  0x2f   :  { %467 = vmatprep.mubr.msk.f32.mxu0 %vm107_vm0, %v17_v27  ;;  %483 = vmatprep.mubr.msk.f32.mxu1 %vm107_vm0, %v49_v28 }
  0x32   :  { %274 = vmatmul.mubr.f32.gmra.mxu0 %v16_v29  ;;  %354 = vmatmul.mubr.f32.gmra.mxu1 %v48_v30 }
  0x33   :  { %468 = vmatprep.mubr.msk.f32.mxu0 %vm107_vm0, %v19_v31  ;;  %484 = vmatprep.mubr.msk.f32.mxu1 %vm107_vm0, %v51_v32 }
  0x36   :  { %279 = vmatmul.mubr.f32.gmra.mxu0 %v18_v33  ;;  %359 = vmatmul.mubr.f32.gmra.mxu1 %v50_v34 }
  0x37   :  { %469 = vmatprep.mubr.msk.f32.mxu0 %vm107_vm0, %v21_v35  ;;  %485 = vmatprep.mubr.msk.f32.mxu1 %vm107_vm0, %v53_v36 }
  0x3a   :  { %284 = vmatmul.mubr.f32.gmra.mxu0 %v20_v37  ;;  %364 = vmatmul.mubr.f32.gmra.mxu1 %v52_v38 }
  0x3b   :  { %470 = vmatprep.mubr.msk.f32.mxu0 %vm107_vm0, %v23_v39  ;;  %486 = vmatprep.mubr.msk.f32.mxu1 %vm107_vm0, %v55_v40 }
  0x3e   :  { %289 = vmatmul.mubr.f32.gmra.mxu0 %v22_v41  ;;  %369 = vmatmul.mubr.f32.gmra.mxu1 %v54_v42 }
  0x3f   :  { %471 = vmatprep.mubr.msk.f32.mxu0 %vm107_vm0, %v25_v43  ;;  %487 = vmatprep.mubr.msk.f32.mxu1 %vm107_vm0, %v57_v44 }
  0x42   :  { %294 = vmatmul.mubr.f32.gmra.mxu0 %v24_v45  ;;  %374 = vmatmul.mubr.f32.gmra.mxu1 %v56_v46 }
  0x43   :  { %472 = vmatprep.mubr.msk.f32.mxu0 %vm107_vm0, %v27_v47  ;;  %488 = vmatprep.mubr.msk.f32.mxu1 %vm107_vm0, %v59_v48 }
  0x46   :  { %299 = vmatmul.mubr.f32.gmra.mxu0 %v26_v49  ;;  %379 = vmatmul.mubr.f32.gmra.mxu1 %v58_v50 }
  0x47   :  { %473 = vmatprep.mubr.msk.f32.mxu0 %vm107_vm0, %v29_v51  ;;  %489 = vmatprep.mubr.msk.f32.mxu1 %vm107_vm0, %v61_v52 }
  0x4a   :  { %304 = vmatmul.mubr.f32.gmra.mxu0 %v28_v53  ;;  %384 = vmatmul.mubr.f32.gmra.mxu1 %v60_v54 }
  0x4b   :  { %474 = vmatprep.mubr.msk.f32.mxu0 %vm107_vm0, %v31_v55  ;;  %490 = vmatprep.mubr.msk.f32.mxu1 %vm107_vm0, %v63_v56 }
  0x4e   :  { %309 = vmatmul.mubr.f32.gmra.mxu0 %v30_v57  ;;  %389 = vmatmul.mubr.f32.gmra.mxu1 %v62_v58 }
  0x4f   :  { %475 = vmatprep.mubr.msk.f32.mxu0 %vm107_vm0, %v33_v59  ;;  %491 = vmatprep.mubr.msk.f32.mxu1 %vm107_vm0, %v65_v60 }
  0x52   :  { %314 = vmatmul.mubr.f32.gmra.mxu0 %v32_v61  ;;  %394 = vmatmul.mubr.f32.gmra.mxu1 %v64_v62 }
  0x53   :  { %476 = vmatprep.mubr.msk.f32.mxu0 %vm107_vm0, %v35_v63  ;;  %492 = vmatprep.mubr.msk.f32.mxu1 %vm107_vm0, %v67_v0 }
  0x56   :  { %319 = vmatmul.mubr.f32.gmra.mxu0 %v34_v1  ;;  %399 = vmatmul.mubr.f32.gmra.mxu1 %v66_v2 }
  0x57   :  { %477 = vmatprep.mubr.msk.f32.mxu0 %vm107_vm0, %v37_v3  ;;  %493 = vmatprep.mubr.msk.f32.mxu1 %vm107_vm0, %v69_v4 }
  0x5a   :  { %324 = vmatmul.mubr.f32.gmra.mxu0 %v36_v5  ;;  %404 = vmatmul.mubr.f32.gmra.mxu1 %v68_v6 }
  0x5b   :  { %478 = vmatprep.mubr.msk.f32.mxu0 %vm107_vm0, %v39_v7  ;;  %494 = vmatprep.mubr.msk.f32.mxu1 %vm107_vm0, %v71_v8 }
  0x5e   :  { %329 = vmatmul.mubr.f32.gmra.mxu0 %v38_v9  ;;  %409 = vmatmul.mubr.f32.gmra.mxu1 %v70_v10 }
  0x5f   :  { %479 = vmatprep.mubr.msk.f32.mxu0 %vm107_vm0, %v41_v11  ;;  %495 = vmatprep.mubr.msk.f32.mxu1 %vm107_vm0, %v73_v12 }
  0x62   :  { %334 = vmatmul.mubr.f32.gmra.mxu0 %v40_v13  ;;  %414 = vmatmul.mubr.f32.gmra.mxu1 %v72_v14 }
  0x63   :  { %480 = vmatprep.mubr.msk.f32.mxu0 %vm107_vm0, %v43_v15  ;;  %496 = vmatprep.mubr.msk.f32.mxu1 %vm107_vm0, %v75_v16 }
  0x66   :  { %339 = vmatmul.mubr.f32.gmra.mxu0 %v42_v17  ;;  %419 = vmatmul.mubr.f32.gmra.mxu1 %v74_v18 }
  0x67   :  { %481 = vmatprep.mubr.msk.f32.mxu0 %vm107_vm0, %v45_v19  ;;  %497 = vmatprep.mubr.msk.f32.mxu1 %vm107_vm0, %v77_v20 }
  0x6a   :  { %344 = vmatmul.mubr.f32.gmra.mxu0 %v44_v21  ;;  %424 = vmatmul.mubr.f32.gmra.mxu1 %v76_v22 }
  0xee   :  { %v270_v24 = vpop.f32.mrf.mxu0  ;;  %v350_v25 = vpop.f32.mrf.mxu1 }
  0xef   :  { %v271_v26 = vadd.f32 %v901_v23, %v270_v24  ;;  %v351_v27 = vadd.f32 %v901_v23, %v350_v25 }
  0xf0   :  { %v272_v28 = vpop.f32.mrf.mxu0  ;;  %v352_v29 = vpop.f32.mrf.mxu1 }
  0xf1   :  { %429 = vst [vmem:[%s1034_s3] sm:$0xff] %v271_v26  ;;  %445 = vst [vmem:[%s1034_s3 + $0x80] sm:$0xff] %v351_v27 }
  0xf2   :  { %v275_v30 = vpop.f32.mrf.mxu0  ;;  %v355_v31 = vpop.f32.mrf.mxu1 }
  0xf3   :  { %v276_v32 = vadd.f32 %v901_v23, %v275_v30  ;;  %v356_v33 = vadd.f32 %v901_v23, %v355_v31 }
  0xf4   :  { %v277_v34 = vpop.f32.mrf.mxu0  ;;  %v357_v35 = vpop.f32.mrf.mxu1 }
  0xf5   :  { %430 = vst [vmem:[%s1034_s3 + $0x8] sm:$0xff] %v276_v32  ;;  %446 = vst [vmem:[%s1034_s3 + $0x88] sm:$0xff] %v356_v33 }
  0xf6   :  { %v280_v36 = vpop.f32.mrf.mxu0  ;;  %v360_v37 = vpop.f32.mrf.mxu1 }
  0xf7   :  { %v281_v38 = vadd.f32 %v901_v23, %v280_v36  ;;  %v361_v39 = vadd.f32 %v901_v23, %v360_v37 }
  0xf8   :  { %v282_v40 = vpop.f32.mrf.mxu0  ;;  %v362_v41 = vpop.f32.mrf.mxu1 }
  0xf9   :  { %431 = vst [vmem:[%s1034_s3 + $0x10] sm:$0xff] %v281_v38  ;;  %447 = vst [vmem:[%s1034_s3 + $0x90] sm:$0xff] %v361_v39 }
  0xfa   :  { %v285_v42 = vpop.f32.mrf.mxu0  ;;  %v365_v43 = vpop.f32.mrf.mxu1 }
  0xfb   :  { %v286_v44 = vadd.f32 %v901_v23, %v285_v42  ;;  %v366_v45 = vadd.f32 %v901_v23, %v365_v43 }
  0xfc   :  { %v287_v46 = vpop.f32.mrf.mxu0  ;;  %v367_v47 = vpop.f32.mrf.mxu1 }
  0xfd   :  { %432 = vst [vmem:[%s1034_s3 + $0x18] sm:$0xff] %v286_v44  ;;  %448 = vst [vmem:[%s1034_s3 + $0x98] sm:$0xff] %v366_v45 }
  0xfe   :  { %v290_v48 = vpop.f32.mrf.mxu0  ;;  %v370_v49 = vpop.f32.mrf.mxu1 }
  0xff   :  { %v291_v50 = vadd.f32 %v901_v23, %v290_v48  ;;  %v371_v51 = vadd.f32 %v901_v23, %v370_v49 }
 0x100   :  { %v292_v52 = vpop.f32.mrf.mxu0  ;;  %v372_v53 = vpop.f32.mrf.mxu1 }
 0x101   :  { %433 = vst [vmem:[%s1034_s3 + $0x20] sm:$0xff] %v291_v50  ;;  %449 = vst [vmem:[%s1034_s3 + $0xa0] sm:$0xff] %v371_v51 }
 0x102   :  { %v295_v54 = vpop.f32.mrf.mxu0  ;;  %v375_v55 = vpop.f32.mrf.mxu1 }
 0x103   :  { %v296_v56 = vadd.f32 %v901_v23, %v295_v54  ;;  %v376_v57 = vadd.f32 %v901_v23, %v375_v55 }
 0x104   :  { %v297_v58 = vpop.f32.mrf.mxu0  ;;  %v377_v59 = vpop.f32.mrf.mxu1 }
 0x105   :  { %434 = vst [vmem:[%s1034_s3 + $0x28] sm:$0xff] %v296_v56  ;;  %450 = vst [vmem:[%s1034_s3 + $0xa8] sm:$0xff] %v376_v57 }
 0x106   :  { %v300_v60 = vpop.f32.mrf.mxu0  ;;  %v380_v61 = vpop.f32.mrf.mxu1 }
 0x107   :  { %v301_v62 = vadd.f32 %v901_v23, %v300_v60  ;;  %v381_v63 = vadd.f32 %v901_v23, %v380_v61 }
 0x108   :  { %v302_v0 = vpop.f32.mrf.mxu0  ;;  %v382_v1 = vpop.f32.mrf.mxu1 }
 0x109   :  { %435 = vst [vmem:[%s1034_s3 + $0x30] sm:$0xff] %v301_v62  ;;  %451 = vst [vmem:[%s1034_s3 + $0xb0] sm:$0xff] %v381_v63 }
 0x10a   :  { %v305_v2 = vpop.f32.mrf.mxu0  ;;  %v385_v3 = vpop.f32.mrf.mxu1 }
 0x10b   :  { %v306_v4 = vadd.f32 %v901_v23, %v305_v2  ;;  %v386_v5 = vadd.f32 %v901_v23, %v385_v3 }
 0x10c   :  { %v307_v6 = vpop.f32.mrf.mxu0  ;;  %v387_v7 = vpop.f32.mrf.mxu1 }
 0x10d   :  { %436 = vst [vmem:[%s1034_s3 + $0x38] sm:$0xff] %v306_v4  ;;  %452 = vst [vmem:[%s1034_s3 + $0xb8] sm:$0xff] %v386_v5 }
 0x10e   :  { %v310_v8 = vpop.f32.mrf.mxu0  ;;  %v390_v9 = vpop.f32.mrf.mxu1 }
 0x10f   :  { %v311_v10 = vadd.f32 %v901_v23, %v310_v8  ;;  %v391_v11 = vadd.f32 %v901_v23, %v390_v9 }
 0x110   :  { %v312_v12 = vpop.f32.mrf.mxu0  ;;  %v392_v13 = vpop.f32.mrf.mxu1 }
 0x111   :  { %437 = vst [vmem:[%s1034_s3 + $0x40] sm:$0xff] %v311_v10  ;;  %453 = vst [vmem:[%s1034_s3 + $0xc0] sm:$0xff] %v391_v11 }
 0x112   :  { %v315_v14 = vpop.f32.mrf.mxu0  ;;  %v395_v15 = vpop.f32.mrf.mxu1 }
 0x113   :  { %v316_v16 = vadd.f32 %v901_v23, %v315_v14  ;;  %v396_v17 = vadd.f32 %v901_v23, %v395_v15 }
 0x114   :  { %v317_v18 = vpop.f32.mrf.mxu0  ;;  %v397_v19 = vpop.f32.mrf.mxu1 }
 0x115   :  { %438 = vst [vmem:[%s1034_s3 + $0x48] sm:$0xff] %v316_v16  ;;  %454 = vst [vmem:[%s1034_s3 + $0xc8] sm:$0xff] %v396_v17 }
 0x116   :  { %v320_v20 = vpop.f32.mrf.mxu0  ;;  %v400_v21 = vpop.f32.mrf.mxu1 }
 0x117   :  { %v321_v22 = vadd.f32 %v901_v23, %v320_v20  ;;  %v401_v24 = vadd.f32 %v901_v23, %v400_v21 }
 0x118   :  { %v322_v25 = vpop.f32.mrf.mxu0  ;;  %v402_v26 = vpop.f32.mrf.mxu1 }
 0x119   :  { %439 = vst [vmem:[%s1034_s3 + $0x50] sm:$0xff] %v321_v22  ;;  %455 = vst [vmem:[%s1034_s3 + $0xd0] sm:$0xff] %v401_v24 }
 0x11a   :  { %v325_v27 = vpop.f32.mrf.mxu0  ;;  %v405_v28 = vpop.f32.mrf.mxu1 }
 0x11b   :  { %v326_v29 = vadd.f32 %v901_v23, %v325_v27  ;;  %v406_v30 = vadd.f32 %v901_v23, %v405_v28 }
 0x11c   :  { %v327_v31 = vpop.f32.mrf.mxu0  ;;  %v407_v32 = vpop.f32.mrf.mxu1 }
 0x11d   :  { %440 = vst [vmem:[%s1034_s3 + $0x58] sm:$0xff] %v326_v29  ;;  %456 = vst [vmem:[%s1034_s3 + $0xd8] sm:$0xff] %v406_v30 }
 0x11e   :  { %v330_v33 = vpop.f32.mrf.mxu0  ;;  %v410_v34 = vpop.f32.mrf.mxu1 }
 0x11f   :  { %v331_v35 = vadd.f32 %v901_v23, %v330_v33  ;;  %v411_v36 = vadd.f32 %v901_v23, %v410_v34 }
 0x120   :  { %v332_v37 = vpop.f32.mrf.mxu0  ;;  %v412_v38 = vpop.f32.mrf.mxu1 }
 0x121   :  { %441 = vst [vmem:[%s1034_s3 + $0x60] sm:$0xff] %v331_v35  ;;  %457 = vst [vmem:[%s1034_s3 + $0xe0] sm:$0xff] %v411_v36 }
 0x122   :  { %v335_v39 = vpop.f32.mrf.mxu0  ;;  %v415_v40 = vpop.f32.mrf.mxu1 }
 0x123   :  { %v336_v41 = vadd.f32 %v901_v23, %v335_v39  ;;  %v416_v42 = vadd.f32 %v901_v23, %v415_v40 }
 0x124   :  { %v337_v43 = vpop.f32.mrf.mxu0  ;;  %v417_v44 = vpop.f32.mrf.mxu1 }
 0x125   :  { %442 = vst [vmem:[%s1034_s3 + $0x68] sm:$0xff] %v336_v41  ;;  %458 = vst [vmem:[%s1034_s3 + $0xe8] sm:$0xff] %v416_v42 }
 0x126   :  { %v340_v45 = vpop.f32.mrf.mxu0  ;;  %v420_v46 = vpop.f32.mrf.mxu1 }
 0x127   :  { %v341_v47 = vadd.f32 %v901_v23, %v340_v45  ;;  %v421_v48 = vadd.f32 %v901_v23, %v420_v46 }
 0x128   :  { %v342_v49 = vpop.f32.mrf.mxu0  ;;  %v422_v50 = vpop.f32.mrf.mxu1 }
 0x129   :  { %443 = vst [vmem:[%s1034_s3 + $0x70] sm:$0xff] %v341_v47  ;;  %459 = vst [vmem:[%s1034_s3 + $0xf0] sm:$0xff] %v421_v48 }
 0x12a   :  { %v345_v51 = vpop.f32.mrf.mxu0  ;;  %v425_v52 = vpop.f32.mrf.mxu1 }
 0x12b   :  { %v346_v53 = vadd.f32 %v901_v23, %v345_v51  ;;  %v426_v54 = vadd.f32 %v901_v23, %v425_v52 }
 0x12c   :  { %v347_v55 = vpop.f32.mrf.mxu0  ;;  %v427_v56 = vpop.f32.mrf.mxu1 }
 0x12d   :  { %444 = vst [vmem:[%s1034_s3 + $0x78] sm:$0xff] %v346_v53  ;;  %460 = vst [vmem:[%s1034_s3 + $0xf8] sm:$0xff] %v426_v54 }

</bundles_post_ra>
